<compile_context>
chip_gen: v5e
topology: v5e:2x2
jax: 0.10.0
libtpu: 0.0.40
codegen_flags: <defaults>
</compile_context>

<pallas_src>
import functools

import jax
import jax.numpy as jnp
from jax import lax
from jax.experimental import pallas as pl
from jax.experimental.pallas import tpu as pltpu


def _ffn_kernel(x_ref, wi_ref, wo_ref, o_ref, acc_ref, *, act: str):
    # x_ref:  (tile_rows, d_model)
    # wi_ref: (tile_ff,  d_model)   torch layout slice of wi.weight [d_ff, d_model]
    # wo_ref: (d_model,  tile_ff)   torch layout slice of wo.weight [d_model, d_ff]
    # o_ref:  (tile_rows, d_model)
    # acc_ref: f32 accumulator, resident across the d_ff (j) grid axis.
    j = pl.program_id(1)

    @pl.when(j == 0)
    def _():
        acc_ref[...] = jnp.zeros_like(acc_ref)

    # h = x @ wi.T  -- contract d_model (last dim of both operands), MXU, f32 acc.
    h = lax.dot_general(
        x_ref[...], wi_ref[...],
        dimension_numbers=(((1,), (1,)), ((), ())),
        preferred_element_type=jnp.float32)

    if act == "relu":
        h = jnp.maximum(h, 0.0)
    elif act == "gelu":
        h = jax.nn.gelu(h, approximate=True)
    else:
        raise ValueError(f"unsupported activation: {act}")

    # TODO(synk): dropout is identity in eval/inference mode; training-mode
    # stochastic dropout (pltpu.prng_seed / prng_random_bits) not implemented.

    # Cast intermediate back to the weight dtype (matches the torch bf16 path),
    # then accumulate the partial wo matmul over this d_ff tile:
    # partial = h @ wo.T -- contract tile_ff (last dim of both operands).
    h = h.astype(wo_ref.dtype)
    acc_ref[...] += lax.dot_general(
        h, wo_ref[...],
        dimension_numbers=(((1,), (1,)), ((), ())),
        preferred_element_type=jnp.float32)

    @pl.when(j == pl.num_programs(1) - 1)
    def _():
        o_ref[...] = acc_ref[...].astype(o_ref.dtype)


def _round_up(x: int, m: int) -> int:
    return (x + m - 1) // m * m


def _pick_ff_tiling(d_ff: int, target: int):
    """Return (tile_ff, d_ff_padded). tile_ff is 128-aligned or == full d_ff."""
    target = max(128, (target // 128) * 128)
    # Largest multiple-of-128 divisor of d_ff that is <= target.
    t = min(target, (d_ff // 128) * 128)
    while t >= 128:
        if d_ff % t == 0:
            return t, d_ff
        t -= 128
    if d_ff <= target:
        # Small/awkward d_ff: use it whole (full-array block dims are allowed).
        return d_ff, d_ff
    # Awkward large d_ff: zero-pad d_ff so a ~target tile divides it (padded
    # columns of wi / wo contribute exactly zero to the output).
    return target, _round_up(d_ff, target)


def _vmem_cap_bytes() -> int:
    """Generation-aware scoped-VMEM cap with headroom for Mosaic scratch."""
    try:
        cap = int(pltpu.get_tpu_info().vmem_capacity_bytes)
    except Exception:
        cap = 64 << 20  # conservative default (v7x per-TC physical VMEM)
    # Never request all of physical VMEM: leave >= 8 MiB / 12.5% headroom.
    # v5e/v6e (128 MiB) -> 112 MiB; v7x (64 MiB) -> 56 MiB.
    return min(cap - (8 << 20), (cap * 7) // 8)


def _vmem_needed_bytes(tile_rows: int, tile_ff: int, d_model: int,
                       itemsize: int) -> int:
    return (2 * tile_rows * d_model * itemsize       # x block (double-buffered)
            + 2 * tile_ff * d_model * itemsize       # wi block (double-buffered)
            + 2 * d_model * tile_ff * itemsize       # wo block (double-buffered)
            + tile_rows * d_model * itemsize         # out block (resident across j)
            + tile_rows * d_model * 4                # f32 accumulator scratch
            + tile_rows * tile_ff * (4 + itemsize)   # f32 h + its narrow cast
            + (4 << 20))                             # compiler headroom


def t5_dense_act_dense(hidden_states: jax.Array,
                       wi_weight: jax.Array,
                       wo_weight: jax.Array,
                       *,
                       act: str = "relu",
                       dropout_rate: float = 0.0,     # eval mode: unused
                       target_tile_rows: int = 1024,
                       target_tile_ff: int = 2048) -> jax.Array:
    """Fused T5 FFN: wo(dropout(act(wi(x)))), eval-mode dropout (identity).

    hidden_states: [..., d_model]
    wi_weight:     [d_ff, d_model]   (torch nn.Linear(d_model, d_ff).weight)
    wo_weight:     [d_model, d_ff]   (torch nn.Linear(d_ff, d_model).weight)
    """
    del dropout_rate  # identity in eval mode

    orig_shape = hidden_states.shape
    d_model = orig_shape[-1]
    d_ff = wi_weight.shape[0]
    assert wi_weight.shape == (d_ff, d_model)
    assert wo_weight.shape == (d_model, d_ff)

    rows = 1
    for d in orig_shape[:-1]:
        rows *= d
    x2d = hidden_states.reshape(rows, d_model)

    out_dtype = hidden_states.dtype
    itemsize = jnp.dtype(out_dtype).itemsize
    pack = 16 if itemsize == 2 else 8   # sublanes per vreg for the dtype

    vmem_cap = _vmem_cap_bytes()

    # Tile selection: start from the large targets and shrink (d_ff first, then
    # rows) until the accurate VMEM budget fits this generation's cap.
    rows_target = max(pack, (target_tile_rows // pack) * pack)
    ff_target = max(128, (target_tile_ff // 128) * 128)
    while True:
        tile_rows = min(rows_target, _round_up(rows, pack))
        tile_ff, d_ff_p = _pick_ff_tiling(d_ff, ff_target)
        if _vmem_needed_bytes(tile_rows, tile_ff, d_model, itemsize) <= vmem_cap:
            break
        if ff_target > 512:
            ff_target //= 2
        elif rows_target > 256:
            rows_target //= 2
        else:
            break  # smallest sensible tiles; let the compiler cope

    # Row handling: small inputs get a tiny (<= pack-1 row) pad; large inputs
    # use a cdiv grid and let Pallas handle the partial last row block (rows
    # are independent, OOB output rows are dropped) -- no full-tensor pad.
    rows_eff = rows
    if rows < tile_rows:
        rows_eff = tile_rows
        x2d = jnp.pad(x2d, ((0, rows_eff - rows), (0, 0)))

    wi_w, wo_w = wi_weight, wo_weight
    if d_ff_p != d_ff:
        wi_w = jnp.pad(wi_w, ((0, d_ff_p - d_ff), (0, 0)))
        wo_w = jnp.pad(wo_w, ((0, 0), (0, d_ff_p - d_ff)))

    grid = (pl.cdiv(rows_eff, tile_rows), d_ff_p // tile_ff)

    vmem_limit = int(min(max(_vmem_needed_bytes(tile_rows, tile_ff, d_model,
                                                itemsize),
                             32 << 20), vmem_cap))

    # Weights are re-streamed from HBM once per row tile -> count that traffic.
    cost = pl.CostEstimate(
        flops=4 * rows * d_model * d_ff,
        transcendentals=0 if act == "relu" else rows * d_ff,
        bytes_accessed=(2 * rows * d_model * itemsize
                        + grid[0] * 2 * d_model * d_ff_p * itemsize),
    )

    out2d = pl.pallas_call(
        functools.partial(_ffn_kernel, act=act),
        out_shape=jax.ShapeDtypeStruct((rows_eff, d_model), out_dtype),
        grid_spec=pltpu.PrefetchScalarGridSpec(
            num_scalar_prefetch=0,
            grid=grid,
            in_specs=[
                pl.BlockSpec((tile_rows, d_model), lambda i, j: (i, 0)),
                pl.BlockSpec((tile_ff, d_model), lambda i, j: (j, 0)),
                pl.BlockSpec((d_model, tile_ff), lambda i, j: (0, j)),
            ],
            out_specs=pl.BlockSpec((tile_rows, d_model), lambda i, j: (i, 0)),
            scratch_shapes=[pltpu.VMEM((tile_rows, d_model), jnp.float32)],
        ),
        compiler_params=pltpu.CompilerParams(
            dimension_semantics=("parallel", "arbitrary"),
            vmem_limit_bytes=vmem_limit),
        cost_estimate=cost,
    )(x2d, wi_w, wo_w)

    if rows_eff != rows:
        out2d = out2d[:rows]
    return out2d.reshape(orig_shape[:-1] + (d_model,))


def _reference(hidden_states, wi_weight, wo_weight, act="relu"):
    # Pure-JAX mirror of the torch forward (eval mode), f32 math with the same
    # narrow intermediate cast as the kernel.
    x = hidden_states.astype(jnp.float32)
    h = x @ wi_weight.astype(jnp.float32).T
    if act == "relu":
        h = jnp.maximum(h, 0.0)
    else:
        h = jax.nn.gelu(h, approximate=True)
    h = h.astype(hidden_states.dtype).astype(jnp.float32)
    out = h @ wo_weight.astype(jnp.float32).T
    return out.astype(hidden_states.dtype)


if __name__ == "__main__":
    key = jax.random.PRNGKey(0)
    k_x, k_wi, k_wo = jax.random.split(key, 3)

    # Small but layout-representative shapes: d_model on the 128-lane axis.
    batch, seq, d_model, d_ff = 2, 8, 128, 256
    dtype = jnp.bfloat16

    x = jax.random.normal(k_x, (batch, seq, d_model), dtype=jnp.float32)
    wi = 0.05 * jax.random.normal(k_wi, (d_ff, d_model), dtype=jnp.float32)
    wo = 0.05 * jax.random.normal(k_wo, (d_model, d_ff), dtype=jnp.float32)

    x = x.astype(dtype)
    wi = wi.astype(dtype)
    wo = wo.astype(dtype)

    out = t5_dense_act_dense(x, wi, wo, act="relu")
    out = jax.block_until_ready(out)

    ref = _reference(x, wi, wo, act="relu")

    assert out.shape == (batch, seq, d_model)
    assert out.dtype == dtype
    assert jnp.allclose(out.astype(jnp.float32), ref.astype(jnp.float32),
                        atol=2e-2, rtol=2e-2)

    print("KERNEL_OK")
</pallas_src>

<mosaic_0001>
module attributes {stable_mosaic.version = 11 : i64} {
  func.func @_ffn_kernel(%arg0: i32, %arg1: i32, %arg2: memref<16x128xbf16, #tpu.memory_space<vmem>>, %arg3: memref<256x128xbf16, #tpu.memory_space<vmem>>, %arg4: memref<128x256xbf16, #tpu.memory_space<vmem>>, %arg5: memref<16x128xbf16, #tpu.memory_space<vmem>>, %arg6: memref<16x128xf32, #tpu.memory_space<vmem>>) attributes {dimension_semantics = [#tpu.dimension_semantics<parallel>, #tpu.dimension_semantics<arbitrary>], iteration_bounds = array<i64: 1, 1>, scalar_prefetch = 0 : i64, scratch_operands = 1 : i64, tpu.core_type = #tpu.core_type<tc>, window_params = [{transform_indices = @transform_0, window_bounds = array<i64: 16, 128>}, {transform_indices = @transform_1, window_bounds = array<i64: 256, 128>}, {transform_indices = @transform_2, window_bounds = array<i64: 128, 256>}, {transform_indices = @transform_3, window_bounds = array<i64: 16, 128>}]} {
    %c0_i32 = arith.constant 0 : i32
    %0 = arith.cmpi eq, %arg1, %c0_i32 : i32
    %1 = arith.extui %0 : i1 to i32
    %c0_i32_0 = arith.constant 0 : i32
    %2 = arith.cmpi ne, %1, %c0_i32_0 : i32
    scf.if %2 {
      %cst_14 = arith.constant 0.000000e+00 : f32
      %17 = vector.broadcast %cst_14 : f32 to vector<16x128xf32>
      %c0_15 = arith.constant 0 : index
      %c0_16 = arith.constant 0 : index
      %18 = vector.load %arg6[%c0_15, %c0_16] : memref<16x128xf32, #tpu.memory_space<vmem>>, vector<16x128xf32>
      tpu.vector_store %arg6[%c0_15, %c0_16], %17 {strides = array<i32>} : memref<16x128xf32, #tpu.memory_space<vmem>>, vector<16x128xf32>,
    } else {
    }
    %c0 = arith.constant 0 : index
    %c0_1 = arith.constant 0 : index
    %3 = vector.load %arg2[%c0, %c0_1] : memref<16x128xbf16, #tpu.memory_space<vmem>>, vector<16x128xbf16>
    %c0_2 = arith.constant 0 : index
    %c0_3 = arith.constant 0 : index
    %4 = vector.load %arg3[%c0_2, %c0_3] : memref<256x128xbf16, #tpu.memory_space<vmem>>, vector<256x128xbf16>
    %cst = arith.constant dense<0.000000e+00> : vector<16x256xf32>
    %5 = tpu.matmul %3, %4, %cst {dimension_numbers = #tpu.dot_dimension_numbers<[1], [1], [0], [0], [0, 0, 1, 0], [], []>} : vector<16x128xbf16>, vector<256x128xbf16>, vector<16x256xf32> -> vector<16x256xf32>
    %cst_4 = arith.constant 0.000000e+00 : f32
    %6 = vector.broadcast %cst_4 : f32 to vector<16x256xf32>
    %7 = arith.maximumf %5, %6 : vector<16x256xf32>
    %8 = arith.truncf %7 : vector<16x256xf32> to vector<16x256xbf16>
    %c0_5 = arith.constant 0 : index
    %c0_6 = arith.constant 0 : index
    %9 = vector.load %arg6[%c0_5, %c0_6] : memref<16x128xf32, #tpu.memory_space<vmem>>, vector<16x128xf32>
    %c0_7 = arith.constant 0 : index
    %c0_8 = arith.constant 0 : index
    %10 = vector.load %arg4[%c0_7, %c0_8] : memref<128x256xbf16, #tpu.memory_space<vmem>>, vector<128x256xbf16>
    %cst_9 = arith.constant dense<0.000000e+00> : vector<16x128xf32>
    %11 = tpu.matmul %8, %10, %cst_9 {dimension_numbers = #tpu.dot_dimension_numbers<[1], [1], [0], [0], [0, 0, 1, 0], [], []>} : vector<16x256xbf16>, vector<128x256xbf16>, vector<16x128xf32> -> vector<16x128xf32>
    %12 = arith.addf %9, %11 : vector<16x128xf32>
    %c0_10 = arith.constant 0 : index
    %c0_11 = arith.constant 0 : index
    %13 = vector.load %arg6[%c0_10, %c0_11] : memref<16x128xf32, #tpu.memory_space<vmem>>, vector<16x128xf32>
    tpu.vector_store %arg6[%c0_10, %c0_11], %12 {strides = array<i32>} : memref<16x128xf32, #tpu.memory_space<vmem>>, vector<16x128xf32>,
    %c0_i32_12 = arith.constant 0 : i32
    %14 = arith.cmpi eq, %arg1, %c0_i32_12 : i32
    %15 = arith.extui %14 : i1 to i32
    %c0_i32_13 = arith.constant 0 : i32
    %16 = arith.cmpi ne, %15, %c0_i32_13 : i32
    scf.if %16 {
      %c0_14 = arith.constant 0 : index
      %c0_15 = arith.constant 0 : index
      %17 = vector.load %arg6[%c0_14, %c0_15] : memref<16x128xf32, #tpu.memory_space<vmem>>, vector<16x128xf32>
      %18 = arith.truncf %17 : vector<16x128xf32> to vector<16x128xbf16>
      %c0_16 = arith.constant 0 : index
      %c0_17 = arith.constant 0 : index
      %19 = vector.load %arg5[%c0_16, %c0_17] : memref<16x128xbf16, #tpu.memory_space<vmem>>, vector<16x128xbf16>
      tpu.vector_store %arg5[%c0_16, %c0_17], %18 {strides = array<i32>} : memref<16x128xbf16, #tpu.memory_space<vmem>>, vector<16x128xbf16>,
    } else {
    }
    return
  }
  func.func @transform_0(%arg0: i32, %arg1: i32) -> (i32, i32) {
    %c0_i32 = arith.constant 0 : i32
    %c0_i32_0 = arith.constant 0 : i32
    return %arg0, %c0_i32 : i32, i32
  }
  func.func @transform_1(%arg0: i32, %arg1: i32) -> (i32, i32) {
    %c0_i32 = arith.constant 0 : i32
    %c0_i32_0 = arith.constant 0 : i32
    return %arg1, %c0_i32 : i32, i32
  }
  func.func @transform_2(%arg0: i32, %arg1: i32) -> (i32, i32) {
    %c0_i32 = arith.constant 0 : i32
    %c0_i32_0 = arith.constant 0 : i32
    return %c0_i32, %arg1 : i32, i32
  }
  func.func @transform_3(%arg0: i32, %arg1: i32) -> (i32, i32) {
    %c0_i32 = arith.constant 0 : i32
    %c0_i32_0 = arith.constant 0 : i32
    return %arg0, %c0_i32 : i32, i32
  }
}

</mosaic_0001>

<bundles_post_ra>
// kernel: tpu_custom_call.1
= control target key start
LH: loop header
LB: loop body
LE: loop exit
PB: predicated region body
PF: predicated region fallthrough
CT: control target
= control target key end

     0   :  { %8 = vsyncpa [#allocation4], 0  ;;  %s726_s0 = inlined_call_operand.hbm [shape: bf16[16,128], index: 0, kind: input, shape index: {}]   ;;  %s727_s1 = inlined_call_operand.hbm [shape: bf16[256,128], index: 1, kind: input, shape index: {}]   ;;  %s728_s2 = inlined_call_operand.hbm [shape: bf16[128,256], index: 2, kind: input, shape index: {}]   ;;  %s729_s3 = inlined_call_operand.hbm [shape: bf16[16,128], index: 3, kind: output, shape index: {}]  }
   0x1   :  { %9 = vsyncpa [#allocation7], 0 }
   0x2   :  { %10 = vsyncpa [#allocation5], 0  ;;  %s28_s14 = sshll.u32 %s727_s1, 4  ;;  %s677_s15 = smov [#allocation6]   ;;  %s29_s14 = int_to_ptr.hbm [resolvable:$true] %s28_s14 }
   0x3   :  { %s30_s16 = sshll.u32 %s677_s15, 4  ;;  %s15_s19 = sshll.u32 %s726_s0, 4  ;;  %s31_s16 = int_to_ptr.vmem [resolvable:$true] %s30_s16  ;;  %s16_s19 = int_to_ptr.hbm [resolvable:$true] %s15_s19 }
   0x4   :  { %s678_s20 = smov 64   ;;  %s679_s21 = smov 4  }
   0x5   :  { %36 = dma.hbm_to_vmem [thread:$0]  %s29_s14, 2048, %s31_s16, [#allocation7], %s678_s20, %s678_s20, %s679_s21  }
   0x6   :  { %s680_s22 = smov [#allocation3]   ;;  %s41_s1 = sshll.u32 %s728_s2, 4  ;;  %s42_s1 = int_to_ptr.hbm [resolvable:$true] %s41_s1 }
   0x7   :  { %s17_s23 = sshll.u32 %s680_s22, 4  ;;  %s681_s0 = smov [#allocation8]   ;;  %s18_s23 = int_to_ptr.vmem [resolvable:$true] %s17_s23 }
   0x8   :  { %23 = dma.hbm_to_vmem [thread:$0]  %s16_s19, 128, %s18_s23, [#allocation4], %s678_s20, %s678_s20, %s679_s21  }
   0x9   :  { %s43_s26 = sshll.u32 %s681_s0, 4  ;;  %s682_s27 = smov 128   ;;  %s44_s26 = int_to_ptr.vmem [resolvable:$true] %s43_s26 }
   0xa   :  { %s683_s28 = smov 8  }
   0xb   :  { %49 = dma.hbm_to_vmem [thread:$0]  %s42_s1, 2048, %s44_s26, [#allocation7], %s682_s27, %s682_s27, %s683_s28  }
   0xc   :  { %671 = dma.done.wait [#allocation4], 128  }
   0xd   :  { %672 = vsyncadd [#allocation4], 4294967168 }
   0xe   :  { %673 = dma.done.wait [#allocation7], 4096  }
   0xf   :  { %674 = vsyncadd [#allocation7], 4294963200  ;;  %v537_v0 = vld [vmem:[#allocation6 + $0x38] sm:$0xff]  ;;  %v536_v2 = vld [vmem:[#allocation6 + $0x30] sm:$0xff]  ;;  %s684_s2 = smov [#allocation9]   ;;  %s383_s5 = sshll.u32 %s729_s3, 4  ;;  %s384_s5 = int_to_ptr.hbm [resolvable:$true] %s383_s5 }
  0x10   :  { %v545_v1 = vld [vmem:[#allocation6 + $0x78] sm:$0xff]  ;;  %204 = vmatpush.bf16.xpose.msra.mxu0 %v537_v0  ;;  %v544_v3 = vld [vmem:[#allocation6 + $0x70] sm:$0xff]  ;;  %v535_v4 = vld [vmem:[#allocation6 + $0x28] sm:$0xff]  ;;  %s381_s29 = sshll.u32 %s684_s2, 4  ;;  %s382_s29 = int_to_ptr.vmem [resolvable:$true] %s381_s29 }
  0x11   :  { %218 = vmatpush.bf16.xpose.msra.mxu1 %v545_v1  ;;  %v543_v5 = vld [vmem:[#allocation6 + $0x68] sm:$0xff]  ;;  %v534_v6 = vld [vmem:[#allocation6 + $0x20] sm:$0xff]  ;;  %v533_v8 = vld [vmem:[#allocation6 + $0x18] sm:$0xff] }
  0x12   :  { %v542_v7 = vld [vmem:[#allocation6 + $0x60] sm:$0xff]  ;;  %v541_v9 = vld [vmem:[#allocation6 + $0x58] sm:$0xff]  ;;  %v523_v10 = vld [vmem:[#allocation8 + $0x70] sm:$0xf] }
  0x13   :  { %v561_v11 = vld [vmem:[#allocation8 + $0x74] sm:$0xf0]  ;;  %v560_v12 = vld [vmem:[#allocation8 + $0x74] sm:$0xf]  ;;  %v525_v14 = vld [vmem:[#allocation8 + $0x78] sm:$0xf0] }
  0x14   :  { %v524_v13 = vor.u32 %v561_v11, %v523_v10  ;;  %v528_v15 = vor.u32 %v560_v12, %v525_v14  ;;  %v532_v16 = vld [vmem:[#allocation6 + $0x10] sm:$0xff]  ;;  %v515_v17 = vld [vmem:[#allocation8 + $0x60] sm:$0xf]  ;;  %v559_v18 = vld [vmem:[#allocation8 + $0x64] sm:$0xf0] }
  0x15   :  { %v540_v19 = vld [vmem:[#allocation6 + $0x50] sm:$0xff]  ;;  %v558_v20 = vld [vmem:[#allocation8 + $0x64] sm:$0xf]  ;;  %v517_v21 = vld [vmem:[#allocation8 + $0x68] sm:$0xf0]  ;;  %v516_v22 = vor.u32 %v559_v18, %v515_v17 }
  0x16   :  { %336 = vmatpush.bf16.xpose.msra.mxu2 %v524_v13  ;;  %350 = vmatpush.bf16.xpose.msra.mxu3 %v528_v15  ;;  %v520_v23 = vor.u32 %v558_v20, %v517_v21  ;;  %v531_v24 = vld [vmem:[#allocation6 + $0x8] sm:$0xff]  ;;  %v507_v25 = vld [vmem:[#allocation8 + $0x50] sm:$0xf]  ;;  %v557_v26 = vld [vmem:[#allocation8 + $0x54] sm:$0xf0] }
  0x17   :  { %v539_v27 = vld [vmem:[#allocation6 + $0x48] sm:$0xff]  ;;  %v556_v28 = vld [vmem:[#allocation8 + $0x54] sm:$0xf]  ;;  %v509_v29 = vld [vmem:[#allocation8 + $0x58] sm:$0xf0]  ;;  %v508_v30 = vor.u32 %v557_v26, %v507_v25 }
  0x18   :  { %205 = vmatpush.bf16.xpose.msra.mxu0 %v536_v2  ;;  %v512_v31 = vor.u32 %v556_v28, %v509_v29  ;;  %v530_v32 = vld [vmem:[#allocation6] sm:$0xff]  ;;  %v555_v34 = vld [vmem:[#allocation8 + $0x44] sm:$0xf0]  ;;  %v501_v37 = vld [vmem:[#allocation8 + $0x48] sm:$0xf0] }
  0x19   :  { %219 = vmatpush.bf16.xpose.msra.mxu1 %v544_v3  ;;  %v499_v33 = vld [vmem:[#allocation8 + $0x40] sm:$0xf]  ;;  %v554_v36 = vld [vmem:[#allocation8 + $0x44] sm:$0xf]  ;;  %v529_v40 = vld [vmem:[#allocation3] sm:$0xff] }
  0x1a   :  { %v538_v35 = vld [vmem:[#allocation6 + $0x40] sm:$0xff]  ;;  %v500_v38 = vor.u32 %v555_v34, %v499_v33  ;;  %v504_v39 = vor.u32 %v554_v36, %v501_v37  ;;  %v491_v41 = vld [vmem:[#allocation8 + $0x30] sm:$0xf]  ;;  %v553_v42 = vld [vmem:[#allocation8 + $0x34] sm:$0xf0] }
  0x1b   :  { %v552_v43 = vld [vmem:[#allocation8 + $0x34] sm:$0xf]  ;;  %v493_v44 = vld [vmem:[#allocation8 + $0x38] sm:$0xf0]  ;;  %v492_v45 = vor.u32 %v553_v42, %v491_v41  ;;  %v483_v47 = vld [vmem:[#allocation8 + $0x20] sm:$0xf] }
  0x1c   :  { %v496_v46 = vor.u32 %v552_v43, %v493_v44  ;;  %v551_v48 = vld [vmem:[#allocation8 + $0x24] sm:$0xf0]  ;;  %v550_v49 = vld [vmem:[#allocation8 + $0x24] sm:$0xf]  ;;  %v485_v50 = vld [vmem:[#allocation8 + $0x28] sm:$0xf0] }
  0x1d   :  { %v484_v51 = vor.u32 %v551_v48, %v483_v47  ;;  %v488_v52 = vor.u32 %v550_v49, %v485_v50  ;;  %v475_v53 = vld [vmem:[#allocation8 + $0x10] sm:$0xf]  ;;  %v549_v54 = vld [vmem:[#allocation8 + $0x14] sm:$0xf0]  ;;  %v548_v55 = vld [vmem:[#allocation8 + $0x14] sm:$0xf] }
  0x1e   :  { %337 = vmatpush.bf16.xpose.msra.mxu2 %v516_v22  ;;  %351 = vmatpush.bf16.xpose.msra.mxu3 %v520_v23  ;;  %v477_v56 = vld [vmem:[#allocation8 + $0x18] sm:$0xf0]  ;;  %v476_v57 = vor.u32 %v549_v54, %v475_v53  ;;  %v467_v59 = vld [vmem:[#allocation8] sm:$0xf]  ;;  %v547_v60 = vld [vmem:[#allocation8 + $0x4] sm:$0xf0] }
  0x1f   :  { %v480_v58 = vor.u32 %v548_v55, %v477_v56  ;;  %v546_v61 = vld [vmem:[#allocation8 + $0x4] sm:$0xf]  ;;  %v468_v62 = vor.u32 %v547_v60, %v467_v59  ;;  %v469_v63 = vld [vmem:[#allocation8 + $0x8] sm:$0xf0] }
  0x20   :  { %206 = vmatpush.bf16.xpose.msra.mxu0 %v535_v4  ;;  %v472_v0 = vor.u32 %v546_v61, %v469_v63 }
  0x21   :  { %220 = vmatpush.bf16.xpose.msra.mxu1 %v543_v5 }
  0x26   :  { %338 = vmatpush.bf16.xpose.msra.mxu2 %v508_v30  ;;  %352 = vmatpush.bf16.xpose.msra.mxu3 %v512_v31 }
  0x28   :  { %207 = vmatpush.bf16.xpose.msra.mxu0 %v534_v6 }
  0x29   :  { %221 = vmatpush.bf16.xpose.msra.mxu1 %v542_v7 }
  0x2e   :  { %339 = vmatpush.bf16.xpose.msra.mxu2 %v500_v38  ;;  %353 = vmatpush.bf16.xpose.msra.mxu3 %v504_v39 }
  0x30   :  { %208 = vmatpush.bf16.xpose.msra.mxu0 %v533_v8 }
  0x31   :  { %222 = vmatpush.bf16.xpose.msra.mxu1 %v541_v9 }
  0x36   :  { %340 = vmatpush.bf16.xpose.msra.mxu2 %v492_v45  ;;  %354 = vmatpush.bf16.xpose.msra.mxu3 %v496_v46 }
  0x38   :  { %209 = vmatpush.bf16.xpose.msra.mxu0 %v532_v16 }
  0x39   :  { %223 = vmatpush.bf16.xpose.msra.mxu1 %v540_v19 }
  0x3e   :  { %341 = vmatpush.bf16.xpose.msra.mxu2 %v484_v51  ;;  %355 = vmatpush.bf16.xpose.msra.mxu3 %v488_v52 }
  0x40   :  { %210 = vmatpush.bf16.xpose.msra.mxu0 %v531_v24 }
  0x41   :  { %224 = vmatpush.bf16.xpose.msra.mxu1 %v539_v27 }
  0x46   :  { %342 = vmatpush.bf16.xpose.msra.mxu2 %v476_v57  ;;  %356 = vmatpush.bf16.xpose.msra.mxu3 %v480_v58 }
  0x48   :  { %211 = vmatpush.bf16.xpose.msra.mxu0 %v530_v32 }
  0x49   :  { %225 = vmatpush.bf16.xpose.msra.mxu1 %v538_v35 }
  0x4e   :  { %343 = vmatpush.bf16.xpose.msra.mxu2 %v468_v62  ;;  %357 = vmatpush.bf16.xpose.msra.mxu3 %v472_v0 }
  0x4f   :  { %212 = vmatmul.bf16.vlgmr.msra.gmra.mxu0 %v529_v40 }
  0x50   :  { %226 = vmatmul.bf16.vlgmr.msra.gmra.mxu1 %v529_v40 }
  0xcc   :  { %v213_v1 = vpop.f32.mrf.mxu0 }
  0xcd   :  { %v227_v2 = vpop.f32.mrf.mxu1  ;;  %v232_v5 = vmax.f32 %v213_v1, 0.0 }
  0xce   :  { %v233_v6 = vmax.f32 %v227_v2, 0.0 }
  0xd4   :  { %v215_v3 = vpop.f32.mrf.mxu0 }
  0xd5   :  { %v229_v4 = vpop.f32.mrf.mxu1  ;;  %v234_v7 = vmax.f32 %v215_v3, 0.0 }
  0xd6   :  { %v235_v8 = vmax.f32 %v229_v4, 0.0 }
  0xd7   :  { %v236_v9 = vpack.c.bf16 %v234_v7, %v232_v5 }
  0xd8   :  { %v237_v10 = vpack.c.bf16 %v235_v8, %v233_v6 }
  0xd9   :  { %344 = vmatmul.bf16.vlgmr.msra.gmra.mxu2 %v236_v9 }
  0xda   :  { %358 = vmatmul.bf16.vlgmr.msra.gmra.mxu3 %v237_v10 }
 0x15c   :  { %v345_v11 = vpop.f32.mrf.mxu2 }
 0x15d   :  { %v359_v12 = vpop.f32.mrf.mxu3 }
 0x15e   :  { %v360_v15 = vadd.f32 %v359_v12, %v345_v11 }
 0x164   :  { %v347_v13 = vpop.f32.mrf.mxu2 }
 0x165   :  { %v361_v14 = vpop.f32.mrf.mxu3 }
 0x166   :  { %v362_v16 = vadd.f32 %v361_v14, %v347_v13 }
 0x168   :  { %v565_v17 = vpack.c.bf16 %v362_v16, %v360_v15 }
 0x16a   :  { %566 = vst [vmem:[#allocation9] sm:$0xff] %v565_v17  }
 0x16b   :  { %389 = dma.vmem_to_hbm [thread:$0]  %s382_s29, 128, %s384_s5, [#allocation5], %s678_s20, %s678_s20, %s679_s21  }
 0x16c   :  { %675 = dma.done.wait [#allocation5], 128  }
 0x16d   :  { %676 = vsyncadd [#allocation5], 4294967168 }
 0x16e   :  { %394 = vsyncpa [#allocation4], 1 }
 0x16f   :  { %395 = vsyncpa [#allocation7], 1 }
 0x170   :  { %396 = vsyncpa [#allocation5], 1 }

</bundles_post_ra>
